<compile_context>
chip_gen: v7x
topology: tpu7x:2x2x1
jax: 0.10.0
libtpu: 0.0.40
codegen_flags: <defaults>
</compile_context>

<pallas_src>
import functools

import jax
import jax.numpy as jnp
from jax.experimental import pallas as pl
from jax.experimental.pallas import tpu as pltpu

_LANES = 128


def _round_up(x, m):
    return ((x + m - 1) // m) * m


def _pick_tile(dim, candidates):
    """Largest candidate that evenly divides `dim` (dim is padded so one always does)."""
    for c in candidates:
        if dim % c == 0:
            return c
    return dim


def _vmem_budget():
    """Return (vmem_limit_bytes, big_vmem) tuned per TPU generation."""
    cap = 64 * 1024 * 1024
    try:
        cap = int(pltpu.get_tpu_info().vmem_capacity_bytes)
    except Exception:
        pass
    if cap >= 100 * 1024 * 1024:            # v5e / v6e: 128 MiB VMEM per core
        return 80 * 1024 * 1024, True
    return 40 * 1024 * 1024, False          # v7x: 64 MiB per TensorCore (or unknown)


def _select_tiles(n_pad, f_pad, h_resident, vmem_limit, big_vmem):
    """Pick (tm, tk).  n_pad is a multiple of 128, so every candidate below that
    is a power of two <= 128 always divides; bigger ones are used when they do."""
    tm_cands = (1024, 512, 256, 128, 64, 32, 16) if big_vmem else (512, 256, 128, 64, 32, 16)
    tk_cands = (2048, 1024, 512, 256, 128) if big_vmem else (1024, 512, 256, 128)
    tm = _pick_tile(n_pad, tm_cands)
    tk = _pick_tile(n_pad, tk_cands)

    # v7x megacore: keep at least 2 row tiles so both TensorCores get work.
    while n_pad // tm < 2 and tm >= 32:
        tm //= 2

    def footprint(tm_, tk_):
        adj_b = 2 * tm_ * tk_ * 2                                   # bf16, double-buffered
        h_b = (2 * n_pad * f_pad * 2) if h_resident else (2 * tk_ * f_pad * 2)
        io_b = 3 * 2 * tm_ * f_pad * 4                              # res in/out + h_out (upper bound)
        return adj_b + h_b + io_b

    # Shrink conservatively if the estimated working set would crowd VMEM.
    while footprint(tm, tk) > 0.7 * vmem_limit and (tk > 128 or tm > 16):
        if tk > 128:
            tk //= 2
        else:
            tm //= 2
    return tm, tk


# --------------------------------------------------------------------------
# Kernel 1: feature transform  xw = x @ W1   (tiled over rows, bf16 output)
# --------------------------------------------------------------------------
def _xw_kernel(x_ref, w_ref, out_ref):
    out_ref[...] = jnp.dot(x_ref[...], w_ref[...],
                           preferred_element_type=jnp.float32).astype(out_ref.dtype)


def feature_transform(x, w, *, tm, vmem_limit):
    n, f_in = x.shape
    f_out = w.shape[1]
    return pl.pallas_call(
        _xw_kernel,
        out_shape=jax.ShapeDtypeStruct((n, f_out), jnp.bfloat16),
        grid_spec=pltpu.PrefetchScalarGridSpec(
            num_scalar_prefetch=0,
            grid=(n // tm,),
            in_specs=[
                pl.BlockSpec((tm, f_in), lambda i: (i, 0)),
                pl.BlockSpec((f_in, f_out), lambda i: (0, 0)),   # W resident (constant index)
            ],
            out_specs=pl.BlockSpec((tm, f_out), lambda i: (i, 0)),
        ),
        compiler_params=pltpu.CompilerParams(
            dimension_semantics=("parallel",),
            vmem_limit_bytes=vmem_limit),
        cost_estimate=pl.CostEstimate(
            flops=2 * n * f_in * f_out,
            transcendentals=0,
            bytes_accessed=4 * n * f_in + 4 * f_in * f_out + 2 * n * f_out),
    )(x, w)


# --------------------------------------------------------------------------
# Kernel 2: one propagation step fused with the LightGCN accumulation:
#   h_new   = adj @ (relu(h) if relu_in else h)        (bf16 operands, f32 acc)
#   res_new = res + alpha * h_new   (or alpha * h_new on the first step)
#   h_out   = bf16(h_new)            (only when a later step still needs h)
# The f32 accumulator is the resident res output block itself.
# --------------------------------------------------------------------------
def _propagate_kernel(alpha_ref, adj_ref, h_ref, *rest, relu_in, has_res,
                      emit_h, h_resident, tk):
    idx = 0
    res_ref = None
    if has_res:
        res_ref = rest[idx]; idx += 1
    h_out_ref = None
    if emit_h:
        h_out_ref = rest[idx]; idx += 1
    res_out_ref = rest[idx]
    acc_ref = res_out_ref            # f32 resident output doubles as the accumulator

    k = pl.program_id(1)

    @pl.when(k == 0)
    def _():
        acc_ref[...] = jnp.zeros_like(acc_ref)

    if h_resident:
        off = pl.multiple_of(k * tk, tk)
        h_in = h_ref[pl.ds(off, tk), :]          # slice the resident whole-array h
    else:
        h_in = h_ref[...]
    if relu_in:
        h_in = jnp.maximum(h_in, 0)

    acc_ref[...] += jnp.dot(adj_ref[...], h_in,   # bf16 x bf16 -> f32 on the MXU
                            preferred_element_type=jnp.float32)

    @pl.when(k == pl.num_programs(1) - 1)
    def _():
        alpha = alpha_ref[0]
        acc = acc_ref[...]
        if emit_h:
            h_out_ref[...] = acc.astype(h_out_ref.dtype)
        if has_res:
            res_out_ref[...] = res_ref[...] + alpha * acc
        else:
            res_out_ref[...] = alpha * acc


def propagate(adj_b, h, res, alpha, *, relu_in, emit_h, h_resident, tm, tk,
              vmem_limit):
    n = adj_b.shape[0]
    f = h.shape[1]
    has_res = res is not None

    alpha_arr = jnp.reshape(jnp.asarray(alpha, dtype=jnp.float32), (1,))

    in_specs = [
        pl.BlockSpec(memory_space=pltpu.MemorySpace.SMEM),      # alpha (runtime scalar)
        pl.BlockSpec((tm, tk), lambda i, k: (i, k)),            # adj tile (bf16)
    ]
    if h_resident:
        in_specs.append(pl.BlockSpec((n, f), lambda i, k: (0, 0)))   # h fetched once
    else:
        in_specs.append(pl.BlockSpec((tk, f), lambda i, k: (k, 0)))  # h streamed per k
    inputs = [alpha_arr, adj_b, h]
    if has_res:
        in_specs.append(pl.BlockSpec((tm, f), lambda i, k: (i, 0)))  # res (f32)
        inputs.append(res)

    out_shapes, out_specs = [], []
    if emit_h:
        out_shapes.append(jax.ShapeDtypeStruct((n, f), jnp.bfloat16))
        out_specs.append(pl.BlockSpec((tm, f), lambda i, k: (i, 0)))
    out_shapes.append(jax.ShapeDtypeStruct((n, f), jnp.float32))
    out_specs.append(pl.BlockSpec((tm, f), lambda i, k: (i, 0)))

    io_aliases = {}
    if has_res:
        io_aliases = {3: (1 if emit_h else 0)}   # alias res input -> res output

    kernel = functools.partial(_propagate_kernel, relu_in=bool(relu_in),
                               has_res=has_res, emit_h=bool(emit_h),
                               h_resident=bool(h_resident), tk=tk)

    bytes_acc = 2 * n * n                                          # adj (bf16)
    bytes_acc += n * f * 2 * (1 if h_resident else n // tm)        # h reads (bf16)
    bytes_acc += (n * f * 4 if has_res else 0) + n * f * 4         # res read + write (f32)
    bytes_acc += (n * f * 2 if emit_h else 0)                      # h_out write (bf16)
    cost = pl.CostEstimate(flops=2 * n * n * f, transcendentals=0,
                           bytes_accessed=bytes_acc)

    single_out = (len(out_shapes) == 1)
    out = pl.pallas_call(
        kernel,
        out_shape=out_shapes[0] if single_out else tuple(out_shapes),
        grid_spec=pltpu.PrefetchScalarGridSpec(
            num_scalar_prefetch=0,
            grid=(n // tm, n // tk),
            in_specs=in_specs,
            out_specs=out_specs[0] if single_out else tuple(out_specs),
        ),
        input_output_aliases=io_aliases,
        compiler_params=pltpu.CompilerParams(
            dimension_semantics=("parallel", "arbitrary"),
            vmem_limit_bytes=vmem_limit),
        cost_estimate=cost,
    )(*inputs)

    if emit_h:
        h_new, res_new = out
    else:
        h_new, res_new = None, out
    return h_new, res_new


# --------------------------------------------------------------------------
# Model wrapper mirroring the PyTorch LightGCN forward pass.
# --------------------------------------------------------------------------
class LightGCNPallas:

    def __init__(self, in_feats, h_feats, key, prop_step=2, dropout=0.2,
                 alpha=0.5, exp=False, relu=False, norm=False):
        self.in_feats = in_feats
        self.h_feats = h_feats
        self.prop_step = prop_step
        self.relu = relu
        self.norm = norm
        # conv1 = GCNConv(in_feats, h_feats, weight=True, bias=False)
        lim = (6.0 / (in_feats + h_feats)) ** 0.5
        self.w1 = jax.random.uniform(key, (in_feats, h_feats), jnp.float32,
                                     -lim, lim)
        # conv2 = GCNConv(h_feats, h_feats, weight=False, bias=False) -> pure adj @ h
        if exp:
            self.alphas = alpha ** jnp.arange(prop_step, dtype=jnp.float32)
        else:
            self.alphas = jnp.ones((prop_step,), jnp.float32)
        # TODO(synk): norm=True path (nn.LayerNorm + nn.Dropout between steps)
        # not implemented; module default norm=False matches this forward.

    def __call__(self, adj, in_feat):
        n = in_feat.shape[0]
        n_pad = _round_up(n, _LANES)                 # pad graph dim (rows & contraction)
        fin_p = _round_up(self.in_feats, _LANES)
        fh_p = _round_up(self.h_feats, _LANES)

        vmem_limit, big_vmem = _vmem_budget()
        h_resident = (n_pad * fh_p * 2) <= 8 * 1024 * 1024    # h in bf16 fits comfortably
        tm, tk = _select_tiles(n_pad, fh_p, h_resident, vmem_limit, big_vmem)

        # Zero padding is exact for this linear propagation: padded weight
        # cols / feature rows / adjacency rows+cols are zero, so padded lanes
        # and rows stay zero through matmul / relu / accumulation.
        x_p = jnp.zeros((n_pad, fin_p), jnp.float32).at[:n, :self.in_feats].set(
            in_feat.astype(jnp.float32))
        w_p = jnp.zeros((fin_p, fh_p), jnp.float32).at[
            :self.in_feats, :self.h_feats].set(self.w1)
        adj_b = jnp.zeros((n_pad, n_pad), jnp.bfloat16).at[:n, :n].set(
            adj.astype(jnp.bfloat16))

        # conv1 transform: xw = x @ W1 (f32 accumulate, stored bf16 — its only
        # consumer is the bf16 MXU operand of the first propagation step).
        xw = feature_transform(x_p, w_p, tm=tm, vmem_limit=vmem_limit)

        # conv1 propagation: h0 = adj @ xw;  res = alphas[0] * h0
        h, res = propagate(adj_b, xw, None, self.alphas[0],
                           relu_in=False, emit_h=(self.prop_step > 1),
                           h_resident=h_resident, tm=tm, tk=tk,
                           vmem_limit=vmem_limit)

        # conv2 propagation steps, fused with res += alphas[i] * h_i
        for i in range(1, self.prop_step):
            emit_h = (i < self.prop_step - 1)   # final h never needed -> skip its writeback
            h, res = propagate(adj_b, h, res, self.alphas[i],
                               relu_in=self.relu, emit_h=emit_h,
                               h_resident=h_resident, tm=tm, tk=tk,
                               vmem_limit=vmem_limit)

        return res[:n, :self.h_feats]


def _reference(adj, x, model):
    """Plain-JAX reference mirroring the kernel's dtype policy:
    f32 x@W1, bf16 adjacency/h operands, f32 accumulation."""
    adj_b = adj.astype(jnp.bfloat16)
    h = jnp.dot(x.astype(jnp.float32), model.w1,
                preferred_element_type=jnp.float32).astype(jnp.bfloat16)
    acc = jnp.dot(adj_b, h, preferred_element_type=jnp.float32)
    res = model.alphas[0] * acc
    h = acc.astype(jnp.bfloat16)
    for i in range(1, model.prop_step):
        hin = jnp.maximum(h, 0) if model.relu else h
        acc = jnp.dot(adj_b, hin, preferred_element_type=jnp.float32)
        res = res + model.alphas[i] * acc
        h = acc.astype(jnp.bfloat16)
    return res


if __name__ == "__main__":
    key = jax.random.PRNGKey(0)
    k_adj, k_x, k_w1, k_w2 = jax.random.split(key, 4)

    N = 64          # graph nodes
    IN_FEATS = 32
    H_FEATS = 32

    # Symmetrically-normalized random dense adjacency (with self-loops).
    a = (jax.random.uniform(k_adj, (N, N)) < 0.1).astype(jnp.float32)
    a = jnp.maximum(a, a.T) + jnp.eye(N, dtype=jnp.float32)
    deg = jnp.sum(a, axis=1)
    d_inv_sqrt = 1.0 / jnp.sqrt(deg)
    adj = a * d_inv_sqrt[:, None] * d_inv_sqrt[None, :]

    x = jax.random.normal(k_x, (N, IN_FEATS), jnp.float32)

    # Config A: module defaults (prop_step=2, relu=False, exp=False).
    m1 = LightGCNPallas(IN_FEATS, H_FEATS, k_w1, prop_step=2, relu=False)
    out1 = jax.block_until_ready(m1(adj, x))
    ref1 = _reference(adj, x, m1)
    assert out1.shape == (N, H_FEATS)
    assert bool(jnp.all(jnp.isfinite(out1)))
    assert jnp.allclose(out1, ref1, atol=2e-2, rtol=2e-2), "mismatch (defaults)"

    # Config B: deeper propagation with relu + exponential alphas.
    m2 = LightGCNPallas(IN_FEATS, H_FEATS, k_w2, prop_step=3, relu=True,
                        exp=True, alpha=0.5)
    out2 = jax.block_until_ready(m2(adj, x))
    ref2 = _reference(adj, x, m2)
    assert jnp.allclose(out2, ref2, atol=2e-2, rtol=2e-2), "mismatch (relu/exp)"

    print("KERNEL_OK")
</pallas_src>

<mosaic_0001>
module attributes {stable_mosaic.version = 11 : i64} {
  func.func @_xw_kernel(%arg0: i32, %arg1: memref<64x128xf32, #tpu.memory_space<vmem>>, %arg2: memref<128x128xf32, #tpu.memory_space<vmem>>, %arg3: memref<64x128xbf16, #tpu.memory_space<vmem>>) attributes {dimension_semantics = [#tpu.dimension_semantics<parallel>], iteration_bounds = array<i64: 2>, scalar_prefetch = 0 : i64, scratch_operands = 0 : i64, tpu.core_type = #tpu.core_type<tc>, window_params = [{transform_indices = @transform_0, window_bounds = array<i64: 64, 128>}, {pipeline_mode = #tpu.pipeline_mode<synchronous>, transform_indices = @transform_1, window_bounds = array<i64: 128, 128>}, {transform_indices = @transform_2, window_bounds = array<i64: 64, 128>}]} {
    %c0 = arith.constant 0 : index
    %c0_0 = arith.constant 0 : index
    %0 = vector.load %arg1[%c0, %c0_0] : memref<64x128xf32, #tpu.memory_space<vmem>>, vector<64x128xf32>
    %c0_1 = arith.constant 0 : index
    %c0_2 = arith.constant 0 : index
    %1 = vector.load %arg2[%c0_1, %c0_2] : memref<128x128xf32, #tpu.memory_space<vmem>>, vector<128x128xf32>
    %cst = arith.constant dense<0.000000e+00> : vector<64x128xf32>
    %2 = tpu.matmul %0, %1, %cst {dimension_numbers = #tpu.dot_dimension_numbers<[1], [0], [0], [1], [0, 0, 1, 1], [], []>} : vector<64x128xf32>, vector<128x128xf32>, vector<64x128xf32> -> vector<64x128xf32>
    %3 = arith.truncf %2 : vector<64x128xf32> to vector<64x128xbf16>
    %c0_3 = arith.constant 0 : index
    %c0_4 = arith.constant 0 : index
    %4 = vector.load %arg3[%c0_3, %c0_4] : memref<64x128xbf16, #tpu.memory_space<vmem>>, vector<64x128xbf16>
    tpu.vector_store %arg3[%c0_3, %c0_4], %3 {strides = array<i32>} : memref<64x128xbf16, #tpu.memory_space<vmem>>, vector<64x128xbf16>,
    return
  }
  func.func @transform_0(%arg0: i32) -> (i32, i32) {
    %c0_i32 = arith.constant 0 : i32
    %c0_i32_0 = arith.constant 0 : i32
    return %arg0, %c0_i32 : i32, i32
  }
  func.func @transform_1(%arg0: i32) -> (i32, i32) {
    %c0_i32 = arith.constant 0 : i32
    %c0_i32_0 = arith.constant 0 : i32
    %c0_i32_1 = arith.constant 0 : i32
    return %c0_i32, %c0_i32_0 : i32, i32
  }
  func.func @transform_2(%arg0: i32) -> (i32, i32) {
    %c0_i32 = arith.constant 0 : i32
    %c0_i32_0 = arith.constant 0 : i32
    return %arg0, %c0_i32 : i32, i32
  }
}

</mosaic_0001>

<bundles_post_ra>
// kernel: tpu_custom_call.1
= control target key start
LH: loop header
LB: loop body
LE: loop exit
PB: predicated region body
PF: predicated region fallthrough
CT: control target
= control target key end

     0   :  { %7 = vsyncpa [#allocation3], 0  ;;  %s1049_s0 = inlined_call_operand.hbm [shape: f32[128,128], index: 0, kind: input, shape index: {}]   ;;  %s1050_s1 = inlined_call_operand.hbm [shape: f32[128,128], index: 1, kind: input, shape index: {}]   ;;  %s1051_s2 = inlined_call_operand.hbm [shape: bf16[128,128], index: 2, kind: output, shape index: {}]  }
   0x1   :  { %9 = vsyncpa [#allocation3 + $0x1], 0 }
   0x2   :  { %10 = vsyncpa [#allocation6], 0 }
   0x3   :  { %11 = vsyncpa [#allocation4], 0 }
   0x4   :  { %13 = vsyncpa [#allocation4 + $0x1], 0  ;;  %s831_s9 = smov 0   ;;  %s833_s10 = smov 0  }
   0x5   :  { %s835_s11 = smov 0   ;;  %s837_s12 = smov 0  }
   0x6 LB: > { %s852_s13 = sadd.s32 4294967295, %s807_s12   ;;  %s445_s14 = sadd.s32 4294967294, %s807_s12   ;;  %s807_s12 = sphi %s837_s12, %s1071_s12   ;;  %s803_s11 = sphi %s835_s11, %s1070_s11   ;;  %s799_s10 = sphi %s833_s10, %s1069_s10   ;;  %s795_s9 = sphi %s831_s9, %s1068_s9  }
   0x7   : > { %p39_p0 = scmp.ne.s32.totalorder %s799_s10, %s795_s9  ;;  %p1052_p1 = scmp.eq.s32.totalorder %s852_s13, 0 }
   0x8   : > { %p90_p3 = scmp.eq.s32.totalorder %s445_s14, 1  ;;  %p446_p5 = scmp.ge.s32.totalorder %s807_s12, 1 }
   0x9   : > { %p861_p4 = por %p1052_p1, %p39_p0  ;;  %p97_p7 = scmp.lt.s32.totalorder %s807_s12, 3 }
   0xa   : > { %p866_p6 = por %p90_p3, %p39_p0  ;;  %s809_s18 = smov [#allocation5]  }
   0xb   : > { %s1055_s15 = scalar_select %p861_p4, 1, 0 }
   0xc   : > { %s1056_s16 = scalar_select %p866_p6, 1, 0 }
   0xd   : > { %p871_p8 = pnand %p446_p5, %p97_p7  ;;  %s109_s19 = sshll.u32 %s809_s18, 4  ;;  %s875_s19 = int_to_ptr.vmem [resolvable:$true] %s109_s19 }
   0xe   : > { %s887_s21 = sadd.s32 1, %s807_s12   ;;  %s26_s22 = sadd.s32 1, %s803_s11 }
   0xf   : > { %s1057_s17 = scalar_select %p871_p8, 1, 0 }
  0x10   : > { %p626_p9 = pneg %p871_p8  ;;  %s23_s23 = ssub.s32 %s807_s12, %s887_s21 }
  0x11   : > { %s679_s26 = scalar_lea.hbm %s1050_s1, 2048 }
  0x12   : > { %p882_p11 = pnand %p626_p9, %p1052_p1  ;;  %p680_p12 = scmp.ne.s32.totalorder %s1050_s1, %s679_s26 }
  0x13   : > { %p686_p5 = scmp.lt.u32.totalorder %s679_s26, %s1050_s1 }
  0x14   : > { %p681_p13 = pneg %p882_p11 }
  0x16   : > { %p682_p0 = pnand %p681_p13, %p680_p12 }
  0x18   : > { %p683_p3 = pneg %p682_p0 }
  0x1a   : > { %p688_p7 = pnand %p686_p5, %p683_p3 }
  0x1c   : > { %691 = shalt.err (!%p688_p7)
}
  0x1d   : > { %s692_s3 = scalar_lea.vmem %s875_s19, 2048  ;;  %p700_p2 = scmp.lt.s32.totalorder %s875_s19, %s875_s19 }
  0x1e   : > { %p693_p9 = scmp.ne.s32.totalorder %s875_s19, %s692_s3  ;;  %p701_p6 = scmp.lt.s32.totalorder %s692_s3, %s692_s3 }
  0x20   : > { %p695_p10 = pnand %p693_p9, %p681_p13  ;;  %p702_p4 = por %p701_p6, %p700_p2 }
  0x22   : > { %p696_p1 = pneg %p695_p10 }
  0x24   : > { %p703_p8 = pnand %p702_p4, %p696_p1 }
  0x26   : > { %706 = shalt.err (!%p703_p8)
}
  0x27   : > { %s810_s4 = smov 128   ;;  %s811_s5 = smov 8  }
  0x28   : > { %629 = dma.hbm_to_vmem [thread:$0]  (!%p882_p11), %s1050_s1, 2048, %s875_s19, [#allocation6], %s810_s4, %s810_s4, %s811_s5  }
  0x29   : > { %p24_p1 = scmp.eq.s32.totalorder %s23_s23, 0  ;;  %p33_p2 = scmp.ne.s32.totalorder %s803_s11, %s799_s10 }
  0x2a   : > { %p34_p4 = scmp.eq.s32.totalorder %s807_s12, 0  ;;  %p639_p6 = scmp.lt.s32.totalorder %s807_s12, 2 }
  0x2b   : > { %s921_s8 = scalar_select %p24_p1, %s803_s11, %s26_s22  }
  0x2c   : > { %p35_p8 = por %p34_p4, %p33_p2  ;;  %p1059_p10 = scmp.eq.s32.totalorder %s852_s13, 1 }
  0x2d   : > { %s123_s18 = sand.u32 1, %s803_s11   ;;  %s469_s20 = sshll.u32 %s807_s12, 10 }
  0x2e   : > { %p925_p12 = por %p1059_p10, %p33_p2  ;;  %s449_s24 = sshll.u32 %s123_s18, 6 }
  0x2f   : > { %s934_s27 = scalar_lea.hbm %s1049_s0, %s469_s20  ;;  %s127_s19 = scalar_lea.vmem [#allocation2], %s449_s24 }
  0x30   : > { %s134_s22 = sshll.u32 %s127_s19, 4  ;;  %p936_p11 = pnand %p639_p6, %p35_p8  ;;  %s940_s22 = int_to_ptr.vmem [resolvable:$true] %s134_s22 }
  0x31   : > { %s942_s28 = scalar_lea.sflag [#allocation3], %s123_s18  ;;  %s707_s29 = scalar_lea.hbm %s934_s27, 1024 }
  0x32   : > { %p708_p13 = scmp.ne.s32.totalorder %s934_s27, %s707_s29  ;;  %p709_p0 = pneg %p936_p11 }
  0x33   : > { %s712_s6 = scalar_lea.hbm %s1049_s0, 2048  ;;  %p713_p7 = scmp.lt.u32.totalorder %s934_s27, %s1049_s0 }
  0x34   : > { %p710_p3 = pnand %p709_p0, %p708_p13  ;;  %p714_p9 = scmp.lt.u32.totalorder %s712_s6, %s707_s29 }
  0x35   : > { %p716_p2 = scmp.lt.u32.totalorder %s707_s29, %s934_s27 }
  0x36   : > { %p711_p5 = pneg %p710_p3  ;;  %p715_p1 = por %p714_p9, %p713_p7 }
  0x38   : > { %p717_p4 = por %p716_p2, %p715_p1 }
  0x3a   : > { %p718_p6 = pnand %p717_p4, %p711_p5 }
  0x3c   : > { %721 = shalt.err (!%p718_p6)
}
  0x3d   : > { %s722_s18 = scalar_lea.vmem %s940_s22, 1024  ;;  %s812_s24 = smov [#allocation2]  }
  0x3e   : > { %p723_p8 = scmp.ne.s32.totalorder %s940_s22, %s722_s18  ;;  %s727_s25 = sshll.u32 %s812_s24, 4  ;;  %s728_s25 = int_to_ptr.vmem [resolvable:$false] %s727_s25 }
  0x3f   : > { %s729_s26 = scalar_lea.vmem %s728_s25, 2048  ;;  %p730_p3 = scmp.lt.s32.totalorder %s940_s22, %s728_s25 }
  0x40   : > { %p725_p10 = pnand %p723_p8, %p709_p0  ;;  %p731_p7 = scmp.lt.s32.totalorder %s729_s26, %s722_s18 }
  0x42   : > { %p726_p13 = pneg %p725_p10  ;;  %p732_p9 = por %p731_p7, %p730_p3 }
  0x44   : > { %p733_p1 = pnand %p732_p9, %p726_p13 }
  0x46   : > { %736 = shalt.err (!%p733_p1)
}
  0x47   : > { %633 = dma.hbm_to_vmem [thread:$0]  (!%p936_p11), %s934_s27, 1024, %s940_s22, %s942_s28, %s810_s4, %s810_s4, %s811_s5  }
  0x48   : > { %p1062_p0 = scmp.ne.s32.totalorder %s1057_s17, 0 }
  0x49   : > { %s976_s19 = sand.u32 (!%p1062_p0), 1, %s799_s10   ;;  %p1063_p5 = scmp.ne.s32.totalorder (!%p1062_p0), %s1055_s15, 0 }
  0x4a   : > { %146 = sbr.rel (%p1062_p0) target bundleno = 354 (0x162), region = 28  ;;  %s453_s29 = sshll.u32 (!%p1062_p0), %s976_s19, 6 }
  0x4b   : > { %s149_s30 = scalar_lea.sflag (!%p1062_p0), [#allocation3], %s976_s19  ;;  %s980_s3 = scalar_lea.vmem (!%p1062_p0), [#allocation2], %s453_s29 }
  0x51   : > { %782 = dma.done.wait (%p1063_p5), %s149_s30, 1024  }
  0x52   : > { %784 = vsyncadd (%p1063_p5), %s149_s30, 4294966272  ;;  %p1064_p11 = scmp.eq.s32.totalorder %s852_s13, 0 }
  0x54   : > { %786 = dma.done.wait (%p1064_p11), [#allocation6], 2048   ;;  %p1065_p2 = pmov %p1064_p11 }
  0x55   : > { %v187_v0 = vld [vmem:[#allocation5] sm:$0xff]  ;;  %v188_v1 = vld [vmem:[#allocation5 + $0x8] sm:$0xff]  ;;  %v189_v2 = vld [vmem:[#allocation5 + $0x10] sm:$0xff]  ;;  %s455_s15 = sshll.u32 %s976_s19, 5  ;;  %s478_s5 = sshll.u32 %s852_s13, 9 }
  0x56   : > { %788 = vsyncadd (%p1065_p2), [#allocation6], 4294965248  ;;  %v570_v3 = vpack.c.bf16 %v188_v1, %v187_v0  ;;  %v190_v4 = vld [vmem:[#allocation5 + $0x18] sm:$0xff]  ;;  %v191_v6 = vld [vmem:[#allocation5 + $0x20] sm:$0xff]  ;;  %s176_s17 = scalar_lea.vmem [#allocation7], %s455_s15  ;;  %s1005_s23 = scalar_lea.hbm %s1051_s2, %s478_s5 }
  0x57   : > { %v574_v5 = vpack.c.bf16 %v190_v4, %v189_v2  ;;  %v192_v7 = vld [vmem:[#allocation5 + $0x28] sm:$0xff]  ;;  %v179_v9 = vld [vmem:[%s980_s3] sm:$0xff]  ;;  %v193_v11 = vld [vmem:[#allocation5 + $0x30] sm:$0xff]  ;;  %s362_s4 = sshll.u32 %s176_s17, 4  ;;  %s349_s13 = scalar_lea.sflag [#allocation4], %s976_s19  ;;  %s1000_s4 = int_to_ptr.vmem [resolvable:$true] %s362_s4 }
  0x58   : > { %571 = vmatprep.subr.bf16.mxu0 %v570_v3  ;;  %602 = vmatprep.subr.bf16.mxu1 %v570_v3  ;;  %v578_v8 = vpack.c.bf16 %v192_v7, %v191_v6  ;;  %v183_v10 = vld [vmem:[%s980_s3 + $0x20] sm:$0xff]  ;;  %v194_v12 = vld [vmem:[#allocation5 + $0x38] sm:$0xff]  ;;  %v196_v15 = vld [vmem:[#allocation5 + $0x48] sm:$0xff]  ;;  %s737_s28 = scalar_lea.vmem %s1000_s4, 512  ;;  %s813_s6 = smov [#allocation7]  }
  0x59   : > { %573 = vmatpush3.bf16.msra.mxu0 %v570_v3  ;;  %610 = vmatpush3.bf16.msra.mxu1 %v570_v3  ;;  %v582_v13 = vpack.c.bf16 %v194_v12, %v193_v11  ;;  %v195_v14 = vld [vmem:[#allocation5 + $0x40] sm:$0xff]  ;;  %v197_v17 = vld [vmem:[#allocation5 + $0x50] sm:$0xff]  ;;  %v198_v18 = vld [vmem:[#allocation5 + $0x58] sm:$0xff]  ;;  %p738_p4 = scmp.ne.s32.totalorder %s1000_s4, %s737_s28  ;;  %s741_s7 = sshll.u32 %s813_s6, 4  ;;  %s742_s7 = int_to_ptr.vmem [resolvable:$false] %s741_s7 }
  0x5a   : > { %575 = vmatprep.subr.bf16.mxu0 %v574_v5  ;;  %603 = vmatprep.subr.bf16.mxu1 %v574_v5  ;;  %v586_v16 = vpack.c.bf16 %v196_v15, %v195_v14  ;;  %v590_v19 = vpack.c.bf16 %v198_v18, %v197_v17  ;;  %v199_v20 = vld [vmem:[#allocation5 + $0x60] sm:$0xff]  ;;  %v200_v21 = vld [vmem:[#allocation5 + $0x68] sm:$0xff]  ;;  %v201_v23 = vld [vmem:[#allocation5 + $0x70] sm:$0xff]  ;;  %s743_s20 = scalar_lea.vmem %s742_s7, 1024  ;;  %p744_p10 = scmp.lt.s32.totalorder %s1000_s4, %s742_s7 }
  0x5b   : > { %558 = vmatprep.mubr.f32.mxu0 %v179_v9  ;;  %564 = vmatprep.mubr.f32.mxu1 %v183_v10  ;;  %v594_v22 = vpack.c.bf16 %v200_v21, %v199_v20  ;;  %v202_v24 = vld [vmem:[#allocation5 + $0x78] sm:$0xff]  ;;  %v180_v26 = vld [vmem:[%s980_s3 + $0x8] sm:$0xff]  ;;  %v181_v28 = vld [vmem:[%s980_s3 + $0x10] sm:$0xff]  ;;  %p739_p6 = pnand %p738_p4, %p925_p12  ;;  %p745_p13 = scmp.lt.s32.totalorder %s743_s20, %s737_s28 }
  0x5c   : > { %v598_v25 = vpack.c.bf16 %v202_v24, %v201_v23  ;;  %v184_v27 = vld [vmem:[%s980_s3 + $0x28] sm:$0xff]  ;;  %v185_v29 = vld [vmem:[%s980_s3 + $0x30] sm:$0xff]  ;;  %v182_v30 = vld [vmem:[%s980_s3 + $0x18] sm:$0xff] }
  0x5d   : > { %577 = vmatpush3.bf16.msra.mxu0 %v574_v5  ;;  %611 = vmatpush3.bf16.msra.mxu1 %v574_v5  ;;  %v186_v31 = vld [vmem:[%s980_s3 + $0x38] sm:$0xff]  ;;  %p740_p8 = pneg %p739_p6  ;;  %p746_p3 = por %p745_p13, %p744_p10 }
  0x5e   : > { %579 = vmatprep.subr.bf16.mxu0 %v578_v8  ;;  %604 = vmatprep.subr.bf16.mxu1 %v578_v8 }
  0x5f   : > { %p747_p7 = pnand %p746_p3, %p740_p8 }
  0x61   : > { %581 = vmatpush3.bf16.msra.mxu0 %v578_v8  ;;  %612 = vmatpush3.bf16.msra.mxu1 %v578_v8 }
  0x62   : > { %583 = vmatprep.subr.bf16.mxu0 %v582_v13  ;;  %605 = vmatprep.subr.bf16.mxu1 %v582_v13 }
  0x65   : > { %585 = vmatpush3.bf16.msra.mxu0 %v582_v13  ;;  %613 = vmatpush3.bf16.msra.mxu1 %v582_v13 }
  0x66   : > { %587 = vmatprep.subr.bf16.mxu0 %v586_v16  ;;  %606 = vmatprep.subr.bf16.mxu1 %v586_v16 }
  0x69   : > { %589 = vmatpush3.bf16.msra.mxu0 %v586_v16  ;;  %614 = vmatpush3.bf16.msra.mxu1 %v586_v16 }
  0x6a   : > { %591 = vmatprep.subr.bf16.mxu0 %v590_v19  ;;  %607 = vmatprep.subr.bf16.mxu1 %v590_v19 }
  0x6d   : > { %593 = vmatpush3.bf16.msra.mxu0 %v590_v19  ;;  %615 = vmatpush3.bf16.msra.mxu1 %v590_v19 }
  0x6e   : > { %595 = vmatprep.subr.bf16.mxu0 %v594_v22  ;;  %608 = vmatprep.subr.bf16.mxu1 %v594_v22 }
  0x71   : > { %597 = vmatpush3.bf16.msra.mxu0 %v594_v22  ;;  %616 = vmatpush3.bf16.msra.mxu1 %v594_v22 }
  0x72   : > { %599 = vmatprep.subr.bf16.mxu0 %v598_v25  ;;  %609 = vmatprep.subr.bf16.mxu1 %v598_v25 }
  0x75   : > { %601 = vmatpush3.bf16.msra.mxu0 %v598_v25  ;;  %617 = vmatpush3.bf16.msra.mxu1 %v598_v25 }
  0x78   : > { %559 = vmatmul.mubr.f32.vlgmr.msra.gmra.mrb[0].mxu0 %v180_v26  ;;  %565 = vmatmul.mubr.f32.vlgmr.msra.gmra.mrb[0].mxu1 %v184_v27 }
  0x79   : > { %561 = vmatprep.mubr.f32.mxu0 %v181_v28  ;;  %567 = vmatprep.mubr.f32.mxu1 %v185_v29 }
  0x7c   : > { %562 = vmatmul.mubr.f32.gmra.mrb[2].mxu0 %v182_v30  ;;  %568 = vmatmul.mubr.f32.gmra.mrb[2].mxu1 %v186_v31 }
 0x14b   : > { %v560_v32 = vpop.f32.mrb[0].mxu0  ;;  %v566_v33 = vpop.f32.mrb[0].mxu1 }
 0x14c   : > { %v269_v34 = vpop.f32.mrb[1].mxu0  ;;  %v289_v35 = vpop.f32.mrb[1].mxu1 }
 0x14d   : > { %v482_v36 = vpack.c.bf16 %v560_v32, %v269_v34  ;;  %v492_v37 = vpack.c.bf16 %v566_v33, %v289_v35 }
 0x14f   : > { %483 = vst [vmem:[%s176_s17] sm:$0xff] %v482_v36   ;;  %500 = vst [vmem:[%s176_s17 + $0x10] sm:$0xff] %v492_v37   ;;  %v563_v38 = vpop.f32.mrb[2].mxu0  ;;  %v569_v39 = vpop.f32.mrb[2].mxu1 }
 0x150   : > { %v279_v40 = vpop.f32.mrb[3].mxu0  ;;  %v299_v41 = vpop.f32.mrb[3].mxu1 }
 0x151   : > { %v487_v42 = vpack.c.bf16 %v563_v38, %v279_v40  ;;  %v497_v43 = vpack.c.bf16 %v569_v39, %v299_v41 }
 0x153   : > { %499 = vst [vmem:[%s176_s17 + $0x8] sm:$0xff] %v487_v42   ;;  %501 = vst [vmem:[%s176_s17 + $0x18] sm:$0xff] %v497_v43  }
 0x154   : > { %750 = shalt.err (!%p747_p7)
}
 0x155   : > { %s751_s18 = scalar_lea.hbm %s1005_s23, 512  ;;  %s755_s26 = scalar_lea.hbm %s1051_s2, 1024 }
 0x156   : > { %p752_p9 = scmp.ne.s32.totalorder %s1005_s23, %s751_s18  ;;  %p756_p5 = scmp.lt.u32.totalorder %s1005_s23, %s1051_s2 }
 0x157   : > { %p757_p11 = scmp.lt.u32.totalorder %s755_s26, %s751_s18  ;;  %p759_p4 = scmp.lt.u32.totalorder %s751_s18, %s1005_s23 }
 0x158   : > { %p753_p1 = pnand %p752_p9, %p925_p12 }
 0x159   : > { %p758_p2 = por %p757_p11, %p756_p5 }
 0x15a   : > { %p754_p0 = pneg %p753_p1 }
 0x15b   : > { %p760_p6 = por %p759_p4, %p758_p2 }
 0x15d   : > { %p761_p8 = pnand %p760_p6, %p754_p0 }
 0x15f   : > { %764 = shalt.err (!%p761_p8)
}
 0x160   : > { %s814_s3 = smov 64   ;;  %s815_s15 = smov 4  }
 0x161   : > { %624 = dma.vmem_to_hbm [thread:$0]  (%p925_p12), %s1000_s4, 512, %s1005_s23, %s349_s13, %s814_s3, %s814_s3, %s815_s15  }
 0x162 PF: > { %s377_s17 = sand.u32 1, %s795_s9   ;;  %p1066_p10 = scmp.ne.s32.totalorder %s1056_s16, 0 }
 0x163   : > { %p1067_p13 = scmp.ge.s32.totalorder %s807_s12, 2  ;;  %s378_s5 = scalar_lea.sflag [#allocation4], %s377_s17 }
 0x165   : > { %p635_p3 = pnand %p1067_p13, %p1066_p10 }
 0x167   : > { %790 = dma.done.wait (!%p635_p3), %s378_s5, 512  }
 0x168   : > { %792 = vsyncadd (!%p635_p3), %s378_s5, 4294966784  ;;  %p16_p7 = scmp.ge.s32.totalorder %s887_s21, 4   ;;  %s1068_s9 = smov %s799_s10 }
 0x169   : > { %s1069_s10 = smov %s803_s11  ;;  %s1070_s11 = smov %s921_s8 }
 0x16a   : > { %s1071_s12 = smov %s887_s21  ;;  %18 = sbr.rel (!%p16_p7) target bundleno = 6 (0x6), region = 77 }
 0x171   :  { %383 = vsyncpa [#allocation3], 1 }
 0x172   :  { %385 = vsyncpa [#allocation3 + $0x1], 1 }
 0x173   :  { %386 = vsyncpa [#allocation6], 1 }
 0x174   :  { %387 = vsyncpa [#allocation4], 1 }
 0x175   :  { %389 = vsyncpa [#allocation4 + $0x1], 1 }

</bundles_post_ra>
